<compile_context>
chip_gen: v7x
topology: tpu7x:2x2x1
jax: 0.10.0
libtpu: 0.0.40
codegen_flags: <defaults>
</compile_context>

<pallas_src>
import math

import jax
import jax.numpy as jnp
from jax.experimental import pallas as pl
from jax.experimental.pallas import tpu as pltpu


def _round_up(x: int, m: int) -> int:
    return pl.cdiv(x, m) * m


def _vmem_budget_bytes() -> int:
    """Per-generation VMEM budget with ~25% headroom (≈48 MiB v7x, ≈96 MiB v5e/v6e)."""
    try:
        cap = pltpu.get_tpu_info().vmem_capacity_bytes
    except Exception:  # conservative fallback if the query is unavailable
        cap = 64 * 1024 * 1024
    return int(cap) * 3 // 4


def _sublane_granularity(dtype) -> int:
    # Rows per packed vreg sublane group: f32 -> 8, bf16 -> 16, int8/fp8 -> 32.
    return 8 * (4 // max(1, jnp.dtype(dtype).itemsize))


def _linear_proj_kernel(x_ref, w_ref, b_ref, o_ref, acc_ref):
    # x_ref: (tile_m, tile_k)      w_ref: (tile_k, tile_n)  (weight already (H, V) layout)
    # b_ref: (1, tile_n) f32       o_ref: (tile_m, tile_n)  acc_ref: (tile_m, tile_n) f32
    @pl.when(pl.program_id(2) == 0)
    def _():
        acc_ref[...] = jnp.zeros_like(acc_ref)

    acc_ref[...] += jnp.dot(
        x_ref[...], w_ref[...], preferred_element_type=jnp.float32
    )

    @pl.when(pl.program_id(2) == pl.num_programs(2) - 1)
    def _():
        o_ref[...] = (acc_ref[...] + b_ref[...]).astype(o_ref.dtype)


def prepare_linear_projection_params(weight, bias, *, tile_n=512, tile_k=None,
                                      compute_dtype=None):
    """One-time (module-init) weight preparation.

    weight: (V, H) torch nn.Linear layout; bias: (V,).
    Transposes to (H, V), optionally casts to compute_dtype, and pads V (and H when
    hidden-axis tiling is requested via tile_k) to tile multiples — all done ONCE,
    outside the per-call path.
    """
    V, H = weight.shape
    assert bias.shape == (V,)

    if compute_dtype is not None:
        weight = weight.astype(compute_dtype)
    w_t = weight.T  # (H, V)

    tile_n = min(tile_n, _round_up(V, 128))
    Vp = _round_up(V, tile_n)

    if tile_k is None:
        # Contract the full hidden dim per grid step (block dim == full array dim).
        tile_k_eff, Hp = H, H
    else:
        tile_k_eff = min(_round_up(tile_k, 128), _round_up(H, 128))
        Hp = _round_up(H, tile_k_eff)

    if Vp != V or Hp != H:
        w_t = jnp.pad(w_t, ((0, Hp - H), (0, Vp - V)))
        bias = jnp.pad(bias, (0, Vp - V))
    b2d = bias.astype(jnp.float32).reshape(1, Vp)

    return {
        "w": w_t, "b": b2d, "V": V, "H": H, "Vp": Vp, "Hp": Hp,
        "tile_n": tile_n, "tile_k": tile_k_eff, "compute_dtype": compute_dtype,
    }


def linear_projection(x, params, *, tile_m=512):
    """x: (B, S, H). Returns (B, S, V) in x.dtype, matching nn.Linear(H, V)."""
    B, S, H = x.shape
    assert H == params["H"]
    out_dtype = x.dtype
    M = B * S
    x2d = x.reshape(M, H)

    cd = params["compute_dtype"]
    if cd is not None:
        x2d = x2d.astype(cd)

    w, b2d = params["w"], params["b"]
    V, Vp, Hp = params["V"], params["Vp"], params["Hp"]
    tile_n, tile_k = params["tile_n"], params["tile_k"]

    x_itemsize = jnp.dtype(x2d.dtype).itemsize
    w_itemsize = jnp.dtype(w.dtype).itemsize
    o_itemsize = jnp.dtype(out_dtype).itemsize

    # tile_m rounded to the sublane packing granularity of the compute dtype.
    sub = _sublane_granularity(x2d.dtype)
    tile_m = min(tile_m, _round_up(M, sub))
    tile_m = _round_up(tile_m, sub)

    budget = _vmem_budget_bytes()

    def est_vmem(tm):
        return (2 * (tm * tile_k * x_itemsize            # x tile (double-buffered)
                     + tile_k * tile_n * w_itemsize      # weight tile
                     + tile_n * 4                        # bias tile
                     + tm * tile_n * o_itemsize)         # output tile
                + tm * tile_n * 4)                       # f32 accumulator scratch

    while est_vmem(tile_m) > budget and tile_m > sub:
        tile_m = max(sub, _round_up(tile_m // 2, sub))

    Mp = _round_up(M, tile_m)
    if Mp != M or Hp != H:
        x2d = jnp.pad(x2d, ((0, Mp - M), (0, Hp - H)))

    num_n, num_m, num_k = Vp // tile_n, Mp // tile_m, Hp // tile_k
    grid = (num_n, num_m, num_k)   # vocab outermost -> weight tile resident across M loop

    est = est_vmem(tile_m)
    vmem_limit = min(est + (4 << 20), budget) if est > 16 * 1024 * 1024 else None

    cost = pl.CostEstimate(
        flops=2 * Mp * Vp * Hp,
        transcendentals=0,
        bytes_accessed=(x2d.size * x_itemsize + w.size * w_itemsize
                        + b2d.size * 4 + Mp * Vp * o_itemsize),
    )

    out = pl.pallas_call(
        _linear_proj_kernel,
        out_shape=jax.ShapeDtypeStruct((Mp, Vp), out_dtype),
        grid_spec=pltpu.PrefetchScalarGridSpec(
            num_scalar_prefetch=0,
            grid=grid,
            in_specs=[
                pl.BlockSpec((tile_m, tile_k), lambda j, i, k: (i, k)),  # x row-tile
                pl.BlockSpec((tile_k, tile_n), lambda j, i, k: (k, j)),  # weight (H,V) tile
                pl.BlockSpec((1, tile_n), lambda j, i, k: (0, j)),       # bias tile
            ],
            out_specs=pl.BlockSpec((tile_m, tile_n), lambda j, i, k: (i, j)),
            scratch_shapes=[pltpu.VMEM((tile_m, tile_n), jnp.float32)],
        ),
        compiler_params=pltpu.CompilerParams(
            dimension_semantics=("parallel", "parallel", "arbitrary"),
            vmem_limit_bytes=vmem_limit,
        ),
        cost_estimate=cost,
    )(x2d, w, b2d)

    if Mp != M or Vp != V:
        out = out[:M, :V]
    return out.reshape(B, S, V)


if __name__ == "__main__":
    # Small shapes consistent with the module: hidden_size=32, item_vocab_size=256.
    batch, seq, hidden, vocab = 2, 8, 32, 256

    key = jax.random.PRNGKey(0)
    k_x, k_w, k_b, k_x2, k_w2, k_b2 = jax.random.split(key, 6)

    # Deterministic param init matching torch nn.Linear default uniform(-1/sqrt(H), 1/sqrt(H)).
    bound = 1.0 / math.sqrt(hidden)
    weight = jax.random.uniform(k_w, (vocab, hidden), jnp.float32, -bound, bound)
    bias = jax.random.uniform(k_b, (vocab,), jnp.float32, -bound, bound)
    x = jax.random.normal(k_x, (batch, seq, hidden), jnp.float32)

    ref = x @ weight.T + bias

    # 1) f32 path, full-H contraction (num_k == 1) — matches the torch module's numerics.
    params_f32 = prepare_linear_projection_params(weight, bias)
    out = jax.block_until_ready(linear_projection(x, params_f32))
    assert out.shape == (batch, seq, vocab)
    assert jnp.allclose(out, ref, atol=1e-5, rtol=1e-5)

    # 2) bf16 weight/activation path — weight pre-cast ONCE at prepare time; f32 accumulation.
    params_bf16 = prepare_linear_projection_params(weight, bias, compute_dtype=jnp.bfloat16)
    out_bf16 = jax.block_until_ready(linear_projection(x, params_bf16))
    assert out_bf16.shape == (batch, seq, vocab)
    assert jnp.allclose(out_bf16.astype(jnp.float32), ref, atol=5e-2, rtol=5e-2)

    # 3) Hidden-axis (K) tiled path: hidden=256, tile_k=128 -> 2 reduction steps through
    #    the pl.when-initialized accumulator (the path large-H / v7x configs would use).
    hidden2 = 256
    bound2 = 1.0 / math.sqrt(hidden2)
    weight2 = jax.random.uniform(k_w2, (vocab, hidden2), jnp.float32, -bound2, bound2)
    bias2 = jax.random.uniform(k_b2, (vocab,), jnp.float32, -bound2, bound2)
    x2 = jax.random.normal(k_x2, (batch, seq, hidden2), jnp.float32)
    ref2 = x2 @ weight2.T + bias2

    params_k = prepare_linear_projection_params(weight2, bias2, tile_k=128)
    out2 = jax.block_until_ready(linear_projection(x2, params_k))
    assert out2.shape == (batch, seq, vocab)
    assert jnp.allclose(out2, ref2, atol=1e-4, rtol=1e-4)

    print("KERNEL_OK")
</pallas_src>

<mosaic_0001>
module attributes {stable_mosaic.version = 11 : i64} {
  func.func @_linear_proj_kernel(%arg0: i32, %arg1: i32, %arg2: i32, %arg3: memref<16x32xf32, #tpu.memory_space<vmem>>, %arg4: memref<32x256xf32, #tpu.memory_space<vmem>>, %arg5: memref<1x256xf32, #tpu.memory_space<vmem>>, %arg6: memref<16x256xf32, #tpu.memory_space<vmem>>, %arg7: memref<16x256xf32, #tpu.memory_space<vmem>>) attributes {dimension_semantics = [#tpu.dimension_semantics<parallel>, #tpu.dimension_semantics<parallel>, #tpu.dimension_semantics<arbitrary>], iteration_bounds = array<i64: 1, 1, 1>, scalar_prefetch = 0 : i64, scratch_operands = 1 : i64, tpu.core_type = #tpu.core_type<tc>, window_params = [{transform_indices = @transform_0, window_bounds = array<i64: 16, 32>}, {transform_indices = @transform_1, window_bounds = array<i64: 32, 256>}, {transform_indices = @transform_2, window_bounds = array<i64: 1, 256>}, {transform_indices = @transform_3, window_bounds = array<i64: 16, 256>}]} {
    %c0_i32 = arith.constant 0 : i32
    %0 = arith.cmpi eq, %arg2, %c0_i32 : i32
    %1 = arith.extui %0 : i1 to i32
    %c0_i32_0 = arith.constant 0 : i32
    %2 = arith.cmpi ne, %1, %c0_i32_0 : i32
    scf.if %2 {
      %cst_10 = arith.constant 0.000000e+00 : f32
      %12 = vector.broadcast %cst_10 : f32 to vector<16x256xf32>
      %c0_11 = arith.constant 0 : index
      %c0_12 = arith.constant 0 : index
      %13 = vector.load %arg7[%c0_11, %c0_12] : memref<16x256xf32, #tpu.memory_space<vmem>>, vector<16x256xf32>
      tpu.vector_store %arg7[%c0_11, %c0_12], %12 {strides = array<i32>} : memref<16x256xf32, #tpu.memory_space<vmem>>, vector<16x256xf32>,
    } else {
    }
    %c0 = arith.constant 0 : index
    %c0_1 = arith.constant 0 : index
    %3 = vector.load %arg7[%c0, %c0_1] : memref<16x256xf32, #tpu.memory_space<vmem>>, vector<16x256xf32>
    %c0_2 = arith.constant 0 : index
    %c0_3 = arith.constant 0 : index
    %4 = vector.load %arg3[%c0_2, %c0_3] : memref<16x32xf32, #tpu.memory_space<vmem>>, vector<16x32xf32>
    %c0_4 = arith.constant 0 : index
    %c0_5 = arith.constant 0 : index
    %5 = vector.load %arg4[%c0_4, %c0_5] : memref<32x256xf32, #tpu.memory_space<vmem>>, vector<32x256xf32>
    %cst = arith.constant dense<0.000000e+00> : vector<16x256xf32>
    %6 = tpu.matmul %4, %5, %cst {dimension_numbers = #tpu.dot_dimension_numbers<[1], [0], [0], [1], [0, 0, 1, 1], [], []>} : vector<16x32xf32>, vector<32x256xf32>, vector<16x256xf32> -> vector<16x256xf32>
    %7 = arith.addf %3, %6 : vector<16x256xf32>
    %c0_6 = arith.constant 0 : index
    %c0_7 = arith.constant 0 : index
    %8 = vector.load %arg7[%c0_6, %c0_7] : memref<16x256xf32, #tpu.memory_space<vmem>>, vector<16x256xf32>
    tpu.vector_store %arg7[%c0_6, %c0_7], %7 {strides = array<i32>} : memref<16x256xf32, #tpu.memory_space<vmem>>, vector<16x256xf32>,
    %c0_i32_8 = arith.constant 0 : i32
    %9 = arith.cmpi eq, %arg2, %c0_i32_8 : i32
    %10 = arith.extui %9 : i1 to i32
    %c0_i32_9 = arith.constant 0 : i32
    %11 = arith.cmpi ne, %10, %c0_i32_9 : i32
    scf.if %11 {
      %c0_10 = arith.constant 0 : index
      %c0_11 = arith.constant 0 : index
      %12 = vector.load %arg7[%c0_10, %c0_11] : memref<16x256xf32, #tpu.memory_space<vmem>>, vector<16x256xf32>
      %c0_12 = arith.constant 0 : index
      %c0_13 = arith.constant 0 : index
      %13 = vector.load %arg5[%c0_12, %c0_13] : memref<1x256xf32, #tpu.memory_space<vmem>>, vector<1x256xf32>
      %14 = vector.broadcast %13 : vector<1x256xf32> to vector<16x256xf32>
      %15 = arith.addf %12, %14 : vector<16x256xf32>
      %c0_14 = arith.constant 0 : index
      %c0_15 = arith.constant 0 : index
      %16 = vector.load %arg6[%c0_14, %c0_15] : memref<16x256xf32, #tpu.memory_space<vmem>>, vector<16x256xf32>
      tpu.vector_store %arg6[%c0_14, %c0_15], %15 {strides = array<i32>} : memref<16x256xf32, #tpu.memory_space<vmem>>, vector<16x256xf32>,
    } else {
    }
    return
  }
  func.func @transform_0(%arg0: i32, %arg1: i32, %arg2: i32) -> (i32, i32) {
    %c0_i32 = arith.constant 0 : i32
    return %arg1, %arg2 : i32, i32
  }
  func.func @transform_1(%arg0: i32, %arg1: i32, %arg2: i32) -> (i32, i32) {
    %c0_i32 = arith.constant 0 : i32
    return %arg2, %arg0 : i32, i32
  }
  func.func @transform_2(%arg0: i32, %arg1: i32, %arg2: i32) -> (i32, i32) {
    %c0_i32 = arith.constant 0 : i32
    %c0_i32_0 = arith.constant 0 : i32
    return %c0_i32, %arg0 : i32, i32
  }
  func.func @transform_3(%arg0: i32, %arg1: i32, %arg2: i32) -> (i32, i32) {
    %c0_i32 = arith.constant 0 : i32
    return %arg1, %arg0 : i32, i32
  }
}

</mosaic_0001>

<bundles_post_ra>
// kernel: tpu_custom_call.1
= control target key start
LH: loop header
LB: loop body
LE: loop exit
PB: predicated region body
PF: predicated region fallthrough
CT: control target
= control target key end

     0   :  { %8 = vsyncpa [#allocation4], 0  ;;  %s369_s0 = inlined_call_operand.hbm [shape: f32[16,32], index: 0, kind: input, shape index: {}]   ;;  %s370_s1 = inlined_call_operand.hbm [shape: f32[32,256], index: 1, kind: input, shape index: {}]   ;;  %s371_s2 = inlined_call_operand.vmem [shape: f32[1,256], index: 2, kind: input, shape index: {}]   ;;  %s372_s3 = inlined_call_operand.hbm [shape: f32[16,256], index: 3, kind: output, shape index: {}]  }
   0x1   :  { %9 = vsyncpa [#allocation7], 0 }
   0x2   :  { %10 = vsyncpa [#allocation5], 0  ;;  %s296_s12 = smov [#allocation3]   ;;  %s224_s16 = scalar_lea.hbm %s369_s0, 256 }
   0x3   :  { %s16_s13 = sshll.u32 %s296_s12, 4  ;;  %p225_p0 = scmp.ne.s32.totalorder %s369_s0, %s224_s16  ;;  %s17_s13 = int_to_ptr.vmem [resolvable:$true] %s16_s13 }
   0x4   :  { %p228_p1 = scmp.lt.u32.totalorder %s224_s16, %s369_s0 }
   0x6   :  { %p230_p2 = pnand %p228_p1, %p225_p0 }
   0x8   :  { %233 = shalt.err (!%p230_p2)
}
   0x9   :  { %s234_s21 = scalar_lea.vmem %s17_s13, 256  ;;  %p239_p4 = scmp.lt.s32.totalorder %s17_s13, %s17_s13 }
   0xa   :  { %p235_p3 = scmp.ne.s32.totalorder %s17_s13, %s234_s21  ;;  %p240_p5 = scmp.lt.s32.totalorder %s234_s21, %s234_s21 }
   0xc   :  { %p241_p6 = por %p240_p5, %p239_p4 }
   0xe   :  { %p242_p7 = pnand %p241_p6, %p235_p3 }
  0x10   :  { %245 = shalt.err (!%p242_p7)
}
  0x11   :  { %s297_s22 = smov 128   ;;  %s298_s23 = smov 8  }
  0x12   :  { %22 = dma.hbm_to_vmem [thread:$0]  %s369_s0, 256, %s17_s13, [#allocation4], %s297_s22, %s297_s22, %s298_s23  }
  0x13   :  { %s299_s26 = smov [#allocation6]   ;;  %s246_s30 = scalar_lea.hbm %s370_s1, 1024 }
  0x14   :  { %s28_s27 = sshll.u32 %s299_s26, 4  ;;  %p247_p8 = scmp.ne.s32.totalorder %s370_s1, %s246_s30  ;;  %s29_s27 = int_to_ptr.vmem [resolvable:$true] %s28_s27 }
  0x15   :  { %p250_p9 = scmp.lt.u32.totalorder %s246_s30, %s370_s1 }
  0x17   :  { %p252_p10 = pnand %p250_p9, %p247_p8 }
  0x19   :  { %255 = shalt.err (!%p252_p10)
}
  0x1a   :  { %s256_s8 = scalar_lea.vmem %s29_s27, 1024  ;;  %p261_p12 = scmp.lt.s32.totalorder %s29_s27, %s29_s27 }
  0x1b   :  { %p257_p11 = scmp.ne.s32.totalorder %s29_s27, %s256_s8  ;;  %p262_p13 = scmp.lt.s32.totalorder %s256_s8, %s256_s8 }
  0x1d   :  { %p263_p0 = por %p262_p13, %p261_p12 }
  0x1f   :  { %p264_p1 = pnand %p263_p0, %p257_p11 }
  0x21   :  { %267 = shalt.err (!%p264_p1)
}
  0x22   :  { %s300_s0 = smov 256   ;;  %s301_s9 = smov 16  }
  0x23   :  { %34 = dma.hbm_to_vmem [thread:$0]  %s370_s1, 1024, %s29_s27, [#allocation7], %s300_s0, %s300_s0, %s301_s9  }
  0x24   :  { %290 = dma.done.wait [#allocation4], 256  }
  0x25   :  { %291 = vsyncadd [#allocation4], 4294967040 }
  0x26   :  { %292 = dma.done.wait [#allocation7], 1024  }
  0x27   :  { %293 = vsyncadd [#allocation7], 4294966272  ;;  %v302_v0 = vmov 0.0   ;;  %v58_v1 = vld [vmem:[#allocation6 + $0x8] sm:$0xff]  ;;  %v60_v2 = vld [vmem:[#allocation6 + $0x18] sm:$0xff]  ;;  %vm65_vm0 = vcmask 261120   ;;  %v166_v15 = vlaneseq }
  0x28   :  { %136 = vmatprep.mubr.f32.mxu0 %v302_v0  ;;  %142 = vmatprep.mubr.f32.mxu1 %v302_v0  ;;  %v57_v3 = vld [vmem:[#allocation6] sm:$0xff]  ;;  %v204_v4 = vpack.c.bf16 %v60_v2, %v58_v1  ;;  %v59_v5 = vld [vmem:[#allocation6 + $0x10] sm:$0xff]  ;;  %v62_v6 = vld [vmem:[#allocation6 + $0x28] sm:$0xff]  ;;  %s303_s13 = smov [#allocation8]  }
  0x29   :  { %v64_v7 = vld [vmem:[#allocation6 + $0x38] sm:$0xff]  ;;  %v206_v8 = vpack.c.bf16 %v59_v5, %v57_v3  ;;  %v61_v10 = vld [vmem:[#allocation6 + $0x20] sm:$0xff]  ;;  %v63_v11 = vld [vmem:[#allocation6 + $0x30] sm:$0xff]  ;;  %v167_v16 = vshrl.u32 %v166_v15, 7  ;;  %s189_s14 = sshll.u32 %s303_s13, 4  ;;  %s190_s14 = int_to_ptr.vmem [resolvable:$true] %s189_s14 }
  0x2a   :  { %v208_v9 = vpack.c.bf16 %v64_v7, %v62_v6  ;;  %205 = vmatprep.subr.bf16.mxu0 %v204_v4  ;;  %212 = vmatprep.subr.bf16.mxu1 %v204_v4  ;;  %v210_v12 = vpack.c.bf16 %v63_v11, %v61_v10  ;;  %v55_v13 = vld [vmem:[#allocation3] sm:$0xff]  ;;  %v56_v14 = vld [vmem:[#allocation3 + $0x8] sm:$0xff]  ;;  %s268_s15 = scalar_lea.vmem %s190_s14, 512  ;;  %p273_p3 = scmp.lt.s32.totalorder %s190_s14, %s190_s14 }
  0x2b   :  { %207 = vmatpush1.bf16.msra.mxu0 %v206_v8  ;;  %214 = vmatpush1.bf16.msra.mxu1 %v206_v8  ;;  %v168_v17 = vsub.s32 0, %v167_v16  ;;  %v164_v18 = vld [vmem:[%s371_s2] sm:$0x3]  ;;  %v172_v19 = vsub.s32 1, %v167_v16  ;;  %p269_p2 = scmp.ne.s32.totalorder %s190_s14, %s268_s15  ;;  %p274_p4 = scmp.lt.s32.totalorder %s268_s15, %s268_s15 }
  0x2c   :  { %209 = vmatprep.subr.bf16.mxu0 %v208_v9  ;;  %213 = vmatprep.subr.bf16.mxu1 %v208_v9 }
  0x2d   :  { %v169_v20 = vrot.slane %v164_v18, %v168_v17  ;;  %v173_v21 = vrot.slane %v164_v18, %v172_v19  ;;  %p275_p5 = por %p274_p4, %p273_p3 }
  0x2f   :  { %211 = vmatpush1.bf16.msra.mxu0 %v210_v12  ;;  %215 = vmatpush1.bf16.msra.mxu1 %v210_v12  ;;  %p276_p6 = pnand %p275_p5, %p269_p2 }
  0x32   :  { %202 = vmatmul.mubr.msk.f32.vlgmr.msra.gmra.mrb[0].mxu0 %vm65_vm0, %v55_v13  ;;  %203 = vmatmul.mubr.msk.f32.vlgmr.msra.gmra.mrb[0].mxu1 %vm65_vm0, %v56_v14 }
 0x105   :  { %v138_v22 = vpop.f32.mrb[0].mxu0  ;;  %v144_v23 = vpop.f32.mrb[0].mxu1 }
 0x106   :  { %v176_v24 = vadd.f32 %v169_v20, %v138_v22  ;;  %v178_v25 = vadd.f32 %v169_v20, %v144_v23  ;;  %v140_v26 = vpop.f32.mrb[1].mxu0  ;;  %v146_v27 = vpop.f32.mrb[1].mxu1 }
 0x107   :  { %v177_v28 = vadd.f32 %v173_v21, %v140_v26  ;;  %v179_v29 = vadd.f32 %v173_v21, %v146_v27 }
 0x108   :  { %180 = vst [vmem:[#allocation8] sm:$0xff] %v176_v24  ;;  %182 = vst [vmem:[#allocation8 + $0x10] sm:$0xff] %v178_v25 }
 0x109   :  { %181 = vst [vmem:[#allocation8 + $0x8] sm:$0xff] %v177_v28  ;;  %183 = vst [vmem:[#allocation8 + $0x18] sm:$0xff] %v179_v29 }
 0x10a   :  { %279 = shalt.err (!%p276_p6)
}
 0x10b   :  { %s280_s17 = scalar_lea.hbm %s372_s3, 512 }
 0x10c   :  { %p281_p7 = scmp.ne.s32.totalorder %s372_s3, %s280_s17  ;;  %p284_p8 = scmp.lt.u32.totalorder %s280_s17, %s372_s3 }
 0x10e   :  { %p286_p9 = pnand %p284_p8, %p281_p7 }
 0x110   :  { %289 = shalt.err (!%p286_p9)
}
 0x111   :  { %195 = dma.vmem_to_hbm [thread:$0]  %s190_s14, 512, %s372_s3, [#allocation5], %s300_s0, %s300_s0, %s301_s9  }
 0x112   :  { %294 = dma.done.wait [#allocation5], 512  }
 0x113   :  { %295 = vsyncadd [#allocation5], 4294966784 }
 0x114   :  { %199 = vsyncpa [#allocation4], 1 }
 0x115   :  { %200 = vsyncpa [#allocation7], 1 }
 0x116   :  { %201 = vsyncpa [#allocation5], 1 }

</bundles_post_ra>
